<compile_context>
chip_gen: v5e
topology: v5e:2x2
jax: 0.10.0
libtpu: 0.0.40
codegen_flags: <defaults>
</compile_context>

<pallas_src>
import jax
import jax.numpy as jnp
from jax.experimental import pallas as pl
from jax.experimental.pallas import tpu as pltpu

FEATURE_NUM = 3


def _round_up(x, m):
    return ((x + m - 1) // m) * m


def linreg_kernel(xt_ref, w_ref, b_ref, o_ref):
    # xt_ref: (F, TILE_N) f32 VMEM block of X^T (batch on lanes)
    # w_ref : (F,)  f32 in SMEM     b_ref: (1,) f32 in SMEM
    # o_ref : (1, TILE_N) f32 lane-dense output block
    f = xt_ref.shape[0]
    acc = xt_ref[0:1, :] * w_ref[0]
    for i in range(1, f):                       # unrolled at trace time (F=3)
        acc = acc + xt_ref[i:i + 1, :] * w_ref[i]
    o_ref[...] = acc + b_ref[0]                 # single unmasked store


def mynet_forward(x, weight, bias, *, tile_n=2048):
    """x: (N, FEATURE_NUM) f32, weight: (FEATURE_NUM, 1) f32, bias: (1,) f32."""
    n, f = x.shape
    tile_n = min(tile_n, _round_up(max(n, 1), 128))   # lane-dense, >=128
    n_pad = _round_up(n, tile_n)

    # Batch on the lane axis: X^T is (F, N_pad); zero-pad the tail.
    x_t = jnp.pad(x.astype(jnp.float32).T, ((0, 0), (0, n_pad - n)))
    w_flat = weight.reshape(-1).astype(jnp.float32)   # (F,)  -> SMEM
    b_flat = bias.reshape(-1).astype(jnp.float32)     # (1,)  -> SMEM

    out = pl.pallas_call(
        linreg_kernel,
        out_shape=jax.ShapeDtypeStruct((1, n_pad), jnp.float32),
        grid=(n_pad // tile_n,),
        in_specs=[
            # (F, tile_n): sublane dim == full array dim F, lane dim % 128 == 0
            pl.BlockSpec((f, tile_n), lambda i: (0, i)),
            pl.BlockSpec(memory_space=pltpu.MemorySpace.SMEM),  # weights
            pl.BlockSpec(memory_space=pltpu.MemorySpace.SMEM),  # bias
        ],
        out_specs=pl.BlockSpec((1, tile_n), lambda i: (0, i)),
        compiler_params=pltpu.CompilerParams(
            dimension_semantics=("parallel",)),
    )(x_t, w_flat, b_flat)

    return out[0, :n].reshape(n, 1)


if __name__ == "__main__":
    key = jax.random.PRNGKey(0)
    N = 1000  # small batch; exercises pad-to-tile + slice-back path

    # Deterministic parameters matching the PyTorch module's __init__:
    #   W = torch.ones(feature_num, 1); b = torch.zeros(1)
    W = jnp.ones((FEATURE_NUM, 1), dtype=jnp.float32)
    b = jnp.zeros((1,), dtype=jnp.float32)

    X = jax.random.normal(key, (N, FEATURE_NUM), dtype=jnp.float32)

    out = mynet_forward(X, W, b)
    out = jax.block_until_ready(out)

    # Reference: same math as torch.mm(X, W) + b.
    ref = X @ W + b
    assert out.shape == (N, 1)
    assert jnp.allclose(out, ref, atol=1e-5, rtol=1e-5)

    print("KERNEL_OK")
</pallas_src>

<mosaic_0001>
module attributes {stable_mosaic.version = 11 : i64} {
  func.func @linreg_kernel(%arg0: i32, %arg1: memref<3x1024xf32, #tpu.memory_space<vmem>>, %arg2: memref<3xf32, #tpu.memory_space<smem>>, %arg3: memref<1xf32, #tpu.memory_space<smem>>, %arg4: memref<1x1024xf32, #tpu.memory_space<vmem>>) attributes {dimension_semantics = [#tpu.dimension_semantics<parallel>], iteration_bounds = array<i64: 1>, scalar_prefetch = 0 : i64, scratch_operands = 0 : i64, tpu.core_type = #tpu.core_type<tc>, window_params = [{transform_indices = @transform_0, window_bounds = array<i64: 3, 1024>}, {transform_indices = @transform_1, window_bounds = array<i64: 3>}, {transform_indices = @transform_2, window_bounds = array<i64: 1>}, {transform_indices = @transform_3, window_bounds = array<i64: 1, 1024>}]} {
    %c0 = arith.constant 0 : index
    %c0_0 = arith.constant 0 : index
    %0 = vector.load %arg1[%c0, %c0_0] : memref<3x1024xf32, #tpu.memory_space<vmem>>, vector<1x1024xf32>
    %c0_1 = arith.constant 0 : index
    %1 = memref.load %arg2[%c0_1] : memref<3xf32, #tpu.memory_space<smem>>
    %2 = vector.broadcast %1 : f32 to vector<1x1024xf32>
    %3 = arith.mulf %0, %2 : vector<1x1024xf32>
    %c1 = arith.constant 1 : index
    %c0_2 = arith.constant 0 : index
    %4 = vector.load %arg1[%c1, %c0_2] : memref<3x1024xf32, #tpu.memory_space<vmem>>, vector<1x1024xf32>
    %c1_3 = arith.constant 1 : index
    %5 = memref.load %arg2[%c1_3] : memref<3xf32, #tpu.memory_space<smem>>
    %6 = vector.broadcast %5 : f32 to vector<1x1024xf32>
    %7 = arith.mulf %4, %6 : vector<1x1024xf32>
    %8 = arith.addf %3, %7 : vector<1x1024xf32>
    %c2 = arith.constant 2 : index
    %c0_4 = arith.constant 0 : index
    %9 = vector.load %arg1[%c2, %c0_4] : memref<3x1024xf32, #tpu.memory_space<vmem>>, vector<1x1024xf32>
    %c2_5 = arith.constant 2 : index
    %10 = memref.load %arg2[%c2_5] : memref<3xf32, #tpu.memory_space<smem>>
    %11 = vector.broadcast %10 : f32 to vector<1x1024xf32>
    %12 = arith.mulf %9, %11 : vector<1x1024xf32>
    %13 = arith.addf %8, %12 : vector<1x1024xf32>
    %c0_6 = arith.constant 0 : index
    %14 = memref.load %arg3[%c0_6] : memref<1xf32, #tpu.memory_space<smem>>
    %15 = vector.broadcast %14 : f32 to vector<1x1024xf32>
    %16 = arith.addf %13, %15 : vector<1x1024xf32>
    %c0_7 = arith.constant 0 : index
    %c0_8 = arith.constant 0 : index
    %17 = vector.load %arg4[%c0_7, %c0_8] : memref<1x1024xf32, #tpu.memory_space<vmem>>, vector<1x1024xf32>
    tpu.vector_store %arg4[%c0_7, %c0_8], %16 {strides = array<i32>} : memref<1x1024xf32, #tpu.memory_space<vmem>>, vector<1x1024xf32>,
    return
  }
  func.func @transform_0(%arg0: i32) -> (i32, i32) {
    %c0_i32 = arith.constant 0 : i32
    %c0_i32_0 = arith.constant 0 : i32
    return %c0_i32, %arg0 : i32, i32
  }
  func.func @transform_1(%arg0: i32) -> i32 {
    %c0_i32 = arith.constant 0 : i32
    %c0_i32_0 = arith.constant 0 : i32
    return %c0_i32 : i32
  }
  func.func @transform_2(%arg0: i32) -> i32 {
    %c0_i32 = arith.constant 0 : i32
    %c0_i32_0 = arith.constant 0 : i32
    return %c0_i32 : i32
  }
  func.func @transform_3(%arg0: i32) -> (i32, i32) {
    %c0_i32 = arith.constant 0 : i32
    %c0_i32_0 = arith.constant 0 : i32
    return %c0_i32, %arg0 : i32, i32
  }
}

</mosaic_0001>

<bundles_post_ra>
// kernel: tpu_custom_call.1
= control target key start
LH: loop header
LB: loop body
LE: loop exit
PB: predicated region body
PF: predicated region fallthrough
CT: control target
= control target key end

     0   :  { %9 = vsyncpa [#allocation4], 0  ;;  %s187_s0 = inlined_call_operand.hbm [shape: f32[3,1024], index: 0, kind: input, shape index: {}]   ;;  %s188_s1 = inlined_call_operand.vmem [shape: f32[3], index: 1, kind: input, shape index: {}]   ;;  %s189_s2 = inlined_call_operand.<no memory space> [shape: f32[1], index: 2, kind: input, shape index: {}]   ;;  %s190_s3 = inlined_call_operand.hbm [shape: f32[1,1024], index: 3, kind: output, shape index: {}]  }
   0x1   :  { %10 = vsyncpa [#allocation6], 0 }
   0x2   :  { %11 = vsyncpa [#allocation5], 0  ;;  %s17_s14 = sshll.u32 %s187_s0, 4  ;;  %s152_s15 = smov [#allocation3]   ;;  %s18_s14 = int_to_ptr.hbm [resolvable:$true] %s17_s14 }
   0x3   :  { %s19_s16 = sshll.u32 %s152_s15, 4  ;;  %s28_s19 = sshll.u32 %s188_s1, 4  ;;  %s20_s16 = int_to_ptr.vmem [resolvable:$true] %s19_s16  ;;  %s29_s19 = int_to_ptr.vmem [resolvable:$true] %s28_s19 }
   0x4   :  { %22 = dma.hbm_to_vmem [thread:$0]  %s18_s14, 512, %s20_s16, [#allocation4]  }
   0x5   :  { %s153_s20 = smov [#allocation7]  }
   0x6   :  { %31 = dma.vmem_to_smem %s29_s19, 16, %s153_s20, [#allocation6]  }
   0x7   :  { %146 = dma.done.wait [#allocation4], 512  }
   0x8   :  { %147 = vsyncadd [#allocation4], 4294966784 }
   0x9   :  { %148 = dma.done.wait [#allocation6], 16  }
   0xa   :  { %149 = vsyncadd [#allocation6], 4294967280 }
   0xb   :  { %42 = sfence }
   0xc   :  { %s44_s21 = sld [smem:[#allocation7]]  ;;  %v43_v0 = vld [vmem:[#allocation3] ss:$4 sm:$0xff]  ;;  %v48_v1 = vld [vmem:[#allocation3 + $0x1] ss:$4 sm:$0xff]  ;;  %v60_v10 = vstv %s189_s2  ;;  %s154_s24 = smov [#allocation8]  }
   0xd   :  { %s81_s22 = sld [smem:[#allocation7 + $0x1]]  ;;  %v54_v3 = vld [vmem:[#allocation3 + $0x2] ss:$4 sm:$0xff]  ;;  %s68_s25 = sshll.u32 %s154_s24, 4  ;;  %s69_s25 = int_to_ptr.vmem [resolvable:$true] %s68_s25 }
   0xe   :  { %s82_s0 = sld [smem:[#allocation7 + $0x2]]  ;;  %s70_s28 = sshll.u32 %s190_s3, 4  ;;  %s71_s28 = int_to_ptr.hbm [resolvable:$true] %s70_s28 }
  0x12   :  { %v45_v2 = vstv %s44_s21 }
  0x13   :  { %v46_v4 = vmul.f32 %v45_v2, %v43_v0  ;;  %v50_v5 = vstv %s81_s22 }
  0x14   :  { %v51_v6 = vmul.f32 %v50_v5, %v48_v1  ;;  %v56_v7 = vstv %s82_s0 }
  0x15   :  { %v57_v8 = vmul.f32 %v56_v7, %v54_v3 }
  0x16   :  { %v52_v9 = vadd.f32 %v51_v6, %v46_v4 }
  0x18   :  { %v58_v11 = vadd.f32 %v57_v8, %v52_v9 }
  0x1a   :  { %v61_v12 = vadd.f32 %v60_v10, %v58_v11 }
  0x1c   :  { %62 = vst [vmem:[#allocation8] sm:$0xff] %v61_v12 }
  0x1d   :  { %73 = dma.vmem_to_hbm [thread:$0]  %s69_s25, 128, %s71_s28, [#allocation5]  }
  0x1e   :  { %150 = dma.done.wait [#allocation5], 128  }
  0x1f   :  { %151 = vsyncadd [#allocation5], 4294967168 }
  0x20   :  { %78 = vsyncpa [#allocation4], 1 }
  0x21   :  { %79 = vsyncpa [#allocation5], 1 }
  0x22   :  { %80 = vsyncpa [#allocation6], 1 }

</bundles_post_ra>
